<compile_context>
chip_gen: v6e
topology: v6e:2x2x1
jax: 0.10.0
libtpu: 0.0.40
codegen_flags: <defaults>
</compile_context>

<pallas_src>
import functools

import numpy as np
import jax
import jax.numpy as jnp
from jax.experimental import pallas as pl
from jax.experimental.pallas import tpu as pltpu


# ----------------------- per-generation VMEM budget --------------------------

_VMEM_LIMIT_CACHE = None


def _vmem_limit():
    """Scoped-VMEM budget chosen per TPU generation."""
    global _VMEM_LIMIT_CACHE
    if _VMEM_LIMIT_CACHE is None:
        cap = None
        try:
            cap = getattr(pltpu.get_tpu_info(), "vmem_capacity_bytes", None)
        except Exception:
            cap = None
        if cap is None:
            _VMEM_LIMIT_CACHE = 48 * 1024 * 1024          # safe default
        elif cap >= 100 * 1024 * 1024:
            _VMEM_LIMIT_CACHE = 100 * 1024 * 1024         # v5e / v6e (128 MiB)
        else:
            _VMEM_LIMIT_CACHE = 42 * 1024 * 1024          # v7x (64 MiB)
    return _VMEM_LIMIT_CACHE


# --------------------------- tiling helpers ----------------------------------

def _fit(dim, desired, align):
    """Largest tile <= desired that divides `dim` and is `align`-aligned.
    Falls back to the full dimension (always a legal block size)."""
    if dim <= desired:
        return dim
    t = (desired // align) * align
    while t >= align:
        if dim % t == 0:
            return t
        t -= align
    return dim


# ----------------------------- Pallas kernels --------------------------------

def _linear_kernel(x_ref, *rest, fuse_ln, apply_gelu, has_residual,
                   head_major, dh):
    # Operand order: x, [ln_g, ln_b], w, b, [residual], out, acc(scratch).
    idx = 0
    if fuse_ln:
        ln_g_ref, ln_b_ref = rest[0], rest[1]
        idx = 2
    w_ref, b_ref = rest[idx], rest[idx + 1]
    idx += 2
    r_ref = None
    if has_residual:
        r_ref = rest[idx]
        idx += 1
    o_ref, acc_ref = rest[idx], rest[idx + 1]

    k = pl.program_id(2)

    @pl.when(k == 0)
    def _():
        acc_ref[...] = jnp.zeros_like(acc_ref)

    x = x_ref[...]
    if fuse_ln:
        # LayerNorm fused into the matmul (requires tk == full K).
        xf = x.astype(jnp.float32)
        mean = jnp.mean(xf, axis=-1, keepdims=True)
        xc = xf - mean
        var = jnp.mean(xc * xc, axis=-1, keepdims=True)
        xn = xc * jax.lax.rsqrt(var + 1e-5) * ln_g_ref[...] + ln_b_ref[...]
        x = xn.astype(x_ref.dtype)

    acc_ref[...] += jnp.dot(x, w_ref[...], preferred_element_type=jnp.float32)

    @pl.when(k == pl.num_programs(2) - 1)
    def _():
        y = acc_ref[...] + b_ref[...].astype(jnp.float32)
        if apply_gelu:
            # exact (erf) GELU, same as F.gelu / nn.GELU() defaults
            y = 0.5 * y * (1.0 + jax.lax.erf(y * 0.7071067811865476))
        if has_residual:
            y = y + r_ref[...].astype(jnp.float32)
        if head_major:
            # (tm, tn) -> head-major (nh, tm, Dh) written slice-by-slice.
            nh = o_ref.shape[1]
            for h in range(nh):
                o_ref[0, h, :, :] = y[:, h * dh:(h + 1) * dh].astype(o_ref.dtype)
        else:
            o_ref[...] = y.astype(o_ref.dtype)


def _layernorm_kernel(x_ref, g_ref, b_ref, o_ref):
    x = x_ref[...].astype(jnp.float32)                     # (tm, C)
    mean = jnp.mean(x, axis=-1, keepdims=True)
    xc = x - mean
    var = jnp.mean(xc * xc, axis=-1, keepdims=True)
    inv = jax.lax.rsqrt(var + 1e-5)
    y = xc * inv * g_ref[...] + b_ref[...]
    o_ref[...] = y.astype(o_ref.dtype)


def _flash_attention_kernel(q_ref, k_ref, v_ref, o_ref, m_sc, l_sc, acc_sc,
                            *, scale, t_actual, needs_mask):
    # q/k/v blocks: (1, hg, tq|tk, Dh) bf16; online softmax over the kv axis.
    ki = pl.program_id(3)

    @pl.when(ki == 0)
    def _():
        m_sc[...] = jnp.full_like(m_sc[...], -jnp.inf)
        l_sc[...] = jnp.zeros_like(l_sc[...])
        acc_sc[...] = jnp.zeros_like(acc_sc[...])

    q = q_ref[0]                                           # (hg, tq, Dh) bf16
    k = k_ref[0]                                           # (hg, tk, Dh) bf16
    v = v_ref[0]                                           # (hg, tk, Dh) bf16

    # bf16 MXU inputs, f32 accumulation; one combined dh^-0.5 scale on s.
    s = jnp.einsum("hqd,hkd->hqk", q, k,
                   preferred_element_type=jnp.float32) * scale
    if needs_mask:
        tk = k.shape[1]
        col = ki * tk + jax.lax.broadcasted_iota(jnp.int32, (1, 1, tk), 2)
        s = jnp.where(col < t_actual, s, -1e30)

    m_prev = m_sc[...]
    m_new = jnp.maximum(m_prev, s.max(axis=-1, keepdims=True))
    alpha = jnp.exp(m_prev - m_new)
    p = jnp.exp(s - m_new)
    l_sc[...] = alpha * l_sc[...] + p.sum(axis=-1, keepdims=True)
    acc_sc[...] = alpha * acc_sc[...] + jnp.einsum(
        "hqk,hkd->hqd", p.astype(v.dtype), v,
        preferred_element_type=jnp.float32)
    m_sc[...] = m_new

    @pl.when(ki == pl.num_programs(3) - 1)
    def _():
        inv = pl.reciprocal(l_sc[...], approx=False)       # (hg, tq, 1)
        dh = acc_sc.shape[-1]
        for h in range(acc_sc.shape[0]):
            # lane-dense write into the (B, T, C) output block
            o_ref[0, :, h * dh:(h + 1) * dh] = (
                acc_sc[h, :, :] * inv[h]).astype(o_ref.dtype)


# ------------------------------ wrappers --------------------------------------

def _matmul(x2, w, b, *, ln=None, residual2=None, apply_gelu=False,
            head_out=None, tm_d=512, tn_d=512, tk_d=1024):
    """x2: (M, K) @ w: (K, N) + b, with optional fused LayerNorm on x,
    fused GELU, fused residual add, and optional head-major output."""
    M, K = x2.shape
    N = w.shape[1]
    fuse_ln = ln is not None
    has_residual = residual2 is not None
    head_major = head_out is not None
    assert not (has_residual and head_major)
    assert not (apply_gelu and has_residual), "epilogue applies GELU before residual"

    tk = K if fuse_ln else _fit(K, tk_d, 128)   # fused LN needs the whole row
    tn = _fit(N, tn_d, 128)
    if head_major:
        B, T, H, Dh = head_out
        if tn % Dh:
            tn = N
        tm = _fit(T, tm_d, 16)                  # tm must divide T (row blocks stay in one batch)
        tpb = T // tm
    else:
        Dh = 0
        tm = _fit(M, tm_d, 16)

    grid = (M // tm, N // tn, K // tk)

    in_specs = [pl.BlockSpec((tm, tk), lambda i, j, k: (i, k))]
    operands = [x2]
    if fuse_ln:
        g, bt = ln
        in_specs += [pl.BlockSpec((1, tk), lambda i, j, k: (0, 0)),
                     pl.BlockSpec((1, tk), lambda i, j, k: (0, 0))]
        operands += [g.reshape(1, K).astype(jnp.float32),
                     bt.reshape(1, K).astype(jnp.float32)]
    in_specs += [pl.BlockSpec((tk, tn), lambda i, j, k: (k, j)),
                 pl.BlockSpec((1, tn), lambda i, j, k: (0, j))]
    operands += [w, b.reshape(1, N)]
    if has_residual:
        in_specs.append(pl.BlockSpec((tm, tn), lambda i, j, k: (i, j)))
        operands.append(residual2)

    if head_major:
        nh = tn // Dh
        out_shape = jax.ShapeDtypeStruct((B, H, T, Dh), x2.dtype)
        out_spec = pl.BlockSpec(
            (1, nh, tm, Dh), lambda i, j, k: (i // tpb, j, i % tpb, 0))
    else:
        out_shape = jax.ShapeDtypeStruct((M, N), x2.dtype)
        out_spec = pl.BlockSpec((tm, tn), lambda i, j, k: (i, j))

    return pl.pallas_call(
        functools.partial(_linear_kernel, fuse_ln=fuse_ln,
                          apply_gelu=apply_gelu, has_residual=has_residual,
                          head_major=head_major, dh=Dh),
        out_shape=out_shape,
        grid=grid,
        in_specs=in_specs,
        out_specs=out_spec,
        scratch_shapes=[pltpu.VMEM((tm, tn), jnp.float32)],
        compiler_params=pltpu.CompilerParams(
            dimension_semantics=("parallel", "parallel", "arbitrary"),
            vmem_limit_bytes=_vmem_limit()),
    )(*operands)


def linear(x, w, b, *, apply_gelu=False, residual=None, ln=None, **tiles):
    """x: (..., K) @ w: (K, N) + b, optional fused LN / GELU / residual."""
    lead = x.shape[:-1]
    K = x.shape[-1]
    N = w.shape[1]
    x2 = x.reshape(-1, K)
    r2 = residual.reshape(-1, N) if residual is not None else None
    out = _matmul(x2, w, b, ln=ln, residual2=r2, apply_gelu=apply_gelu, **tiles)
    return out.reshape(*lead, N)


def linear_heads(x, w, b, *, n_head, ln=None, **tiles):
    """x: (B, T, K) @ w: (K, C) + b, written head-major as (B, H, T, Dh)."""
    B, T, K = x.shape
    N = w.shape[1]
    Dh = N // n_head
    x2 = x.reshape(-1, K)
    return _matmul(x2, w, b, ln=ln, head_out=(B, T, n_head, Dh), **tiles)


def layernorm(x, g, b, *, tm_d=512):
    lead = x.shape[:-1]
    C = x.shape[-1]
    x2 = x.reshape(-1, C)
    M = x2.shape[0]
    tm = _fit(M, tm_d, 16)
    out = pl.pallas_call(
        _layernorm_kernel,
        out_shape=jax.ShapeDtypeStruct((M, C), x.dtype),
        grid=(M // tm,),
        in_specs=[pl.BlockSpec((tm, C), lambda i: (i, 0)),
                  pl.BlockSpec((1, C), lambda i: (0, 0)),
                  pl.BlockSpec((1, C), lambda i: (0, 0))],
        out_specs=pl.BlockSpec((tm, C), lambda i: (i, 0)),
        compiler_params=pltpu.CompilerParams(
            dimension_semantics=("parallel",),
            vmem_limit_bytes=_vmem_limit()),
    )(x2, g.reshape(1, C), b.reshape(1, C))
    return out.reshape(*lead, C)


def attention(q, k, v, scale, t_actual, *, tq_d=256, tk_d=1536):
    """q, k, v: (B, H, T, Dh) head-major -> out: (B, T, H*Dh) lane-dense."""
    B, H, T, Dh = q.shape
    # head-group packs the output lanes to a 128 multiple (or all heads).
    hg = next((h for h in range(1, H + 1)
               if H % h == 0 and (h * Dh) % 128 == 0), H)
    G = H // hg
    tq = _fit(T, tq_d, 16)
    tk = _fit(T, tk_d, 128)        # KV tile spans the full padded seq when it fits
    grid = (B, G, T // tq, T // tk)

    q_spec = pl.BlockSpec((1, hg, tq, Dh), lambda b, g, qi, ki: (b, g, qi, 0))
    kv_spec = pl.BlockSpec((1, hg, tk, Dh), lambda b, g, qi, ki: (b, g, ki, 0))
    o_spec = pl.BlockSpec((1, tq, hg * Dh), lambda b, g, qi, ki: (b, qi, g))

    return pl.pallas_call(
        functools.partial(_flash_attention_kernel, scale=float(scale),
                          t_actual=int(t_actual),
                          needs_mask=bool(t_actual < T)),
        out_shape=jax.ShapeDtypeStruct((B, T, H * Dh), q.dtype),
        grid=grid,
        in_specs=[q_spec, kv_spec, kv_spec],
        out_specs=o_spec,
        scratch_shapes=[pltpu.VMEM((hg, tq, 1), jnp.float32),
                        pltpu.VMEM((hg, tq, 1), jnp.float32),
                        pltpu.VMEM((hg, tq, Dh), jnp.float32)],
        compiler_params=pltpu.CompilerParams(
            dimension_semantics=("parallel", "parallel", "parallel",
                                 "arbitrary"),
            vmem_limit_bytes=_vmem_limit()),
    )(q, k, v)


def conv1d_gelu(x, w_flat, b, stride):
    """x: (B, T, Cin) channels-last; kernel_size=3, padding=1.
    w_flat: (3*Cin, Cout) with feature layout [tap0|tap1|tap2]."""
    # TODO(synk): accumulate the 3 taps inside the matmul kernel (shifted x
    # index maps / extra tap grid axis) instead of materializing im2col patches.
    B, T, Cin = x.shape
    xp = jnp.pad(x, ((0, 0), (1, 1), (0, 0)))
    T_out = (T + 2 - 3) // stride + 1
    taps = [xp[:, kk:kk + stride * (T_out - 1) + 1:stride, :] for kk in range(3)]
    patches = jnp.concatenate(taps, axis=-1)              # (B, T_out, 3*Cin)
    return linear(patches, w_flat, b, apply_gelu=True)    # fused GELU epilogue


# ------------------------------ model -----------------------------------------

def sinusoids(length, channels, max_timescale=10000):
    assert channels % 2 == 0
    log_inc = np.log(max_timescale) / (channels // 2 - 1)
    inv = np.exp(-log_inc * np.arange(channels // 2))
    scaled = np.arange(length)[:, None] * inv[None, :]
    return jnp.asarray(
        np.concatenate([np.sin(scaled), np.cos(scaled)], axis=1),
        dtype=jnp.float32)


def init_params(key, n_mels, n_audio_ctx, n_audio_state, n_audio_layer):
    def nxt():
        nonlocal key
        key, sub = jax.random.split(key)
        return sub

    def w(shape, scale=0.02, dtype=jnp.bfloat16):
        return (scale * jax.random.normal(nxt(), shape)).astype(dtype)

    C = n_audio_state
    params = {
        # conv weights stored as (3*Cin, Cout) to match im2col layout
        "conv1_w": w((3 * n_mels, C)), "conv1_b": w((C,), dtype=jnp.float32),
        "conv2_w": w((3 * C, C)),      "conv2_b": w((C,), dtype=jnp.float32),
        "pos_emb": sinusoids(n_audio_ctx, C),
        "ln_post_g": jnp.ones((C,), jnp.float32),
        "ln_post_b": jnp.zeros((C,), jnp.float32),
        "blocks": [],
    }
    for _ in range(n_audio_layer):
        blk = {
            "attn_ln_g": jnp.ones((C,), jnp.float32),
            "attn_ln_b": jnp.zeros((C,), jnp.float32),
            "q_w": w((C, C)), "q_b": w((C,), dtype=jnp.float32),
            "k_w": w((C, C)), "k_b": jnp.zeros((C,), jnp.float32),  # key: bias=False
            "v_w": w((C, C)), "v_b": w((C,), dtype=jnp.float32),
            "out_w": w((C, C)), "out_b": w((C,), dtype=jnp.float32),
            "mlp_ln_g": jnp.ones((C,), jnp.float32),
            "mlp_ln_b": jnp.zeros((C,), jnp.float32),
            "mlp1_w": w((C, 4 * C)), "mlp1_b": w((4 * C,), dtype=jnp.float32),
            "mlp2_w": w((4 * C, C)), "mlp2_b": w((C,), dtype=jnp.float32),
        }
        params["blocks"].append(blk)
    return params


def residual_attention_block(x, p, n_head, t_actual):
    B, T, C = x.shape
    dh = C // n_head

    # --- self attention (pre-LN fused into the projections) ---
    ln_attn = (p["attn_ln_g"], p["attn_ln_b"])
    q = linear_heads(x, p["q_w"], p["q_b"], n_head=n_head, ln=ln_attn)
    k = linear_heads(x, p["k_w"], p["k_b"], n_head=n_head, ln=ln_attn)
    v = linear_heads(x, p["v_w"], p["v_b"], n_head=n_head, ln=ln_attn)
    # q,k scaled by dh^-0.25 each in torch == one dh^-0.5 scale on the scores.
    o = attention(q, k, v, scale=dh ** (-0.5), t_actual=t_actual)  # (B, T, C)
    x = linear(o, p["out_w"], p["out_b"], residual=x)              # fused residual

    # --- MLP (pre-LN fused into MLP1) ---
    h = linear(x, p["mlp1_w"], p["mlp1_b"],
               ln=(p["mlp_ln_g"], p["mlp_ln_b"]), apply_gelu=True)
    x = linear(h, p["mlp2_w"], p["mlp2_b"], residual=x)            # fused residual
    return x


def whisper_encoder_forward(x, params, n_head):
    """x: (batch, n_mels, n_ctx)  -- same layout as the PyTorch module."""
    x = jnp.transpose(x, (0, 2, 1)).astype(jnp.bfloat16)   # -> (B, T, n_mels)
    x = conv1d_gelu(x, params["conv1_w"], params["conv1_b"], stride=1)
    x = conv1d_gelu(x, params["conv2_w"], params["conv2_b"], stride=2)
    assert x.shape[1:] == params["pos_emb"].shape, "incorrect audio shape"
    x = (x + params["pos_emb"][None]).astype(jnp.bfloat16)

    # Pad the sequence to a multiple of 128 (e.g. 1500 -> 1536) so every block
    # tiles cleanly and flash attention never degenerates; padded keys are
    # masked inside the attention kernel and padded rows are sliced off below.
    B, T, C = x.shape
    t_pad = -(-T // 128) * 128
    if t_pad != T:
        x = jnp.pad(x, ((0, 0), (0, t_pad - T), (0, 0)))

    for blk in params["blocks"]:
        x = residual_attention_block(x, blk, n_head, t_actual=T)
    x = layernorm(x, params["ln_post_g"], params["ln_post_b"])
    return x[:, :T, :].astype(jnp.float32)


# ------------------------------ main -------------------------------------------

if __name__ == "__main__":
    # Small synthetic configuration
    batch = 2
    n_mels = 16
    n_ctx_in = 16                      # mel-frame length fed to conv1
    n_audio_ctx = n_ctx_in // 2        # after stride-2 conv2
    n_audio_state = 32
    n_audio_head = 4
    n_audio_layer = 2

    key = jax.random.PRNGKey(0)
    key, pkey, xkey = jax.random.split(key, 3)
    params = init_params(pkey, n_mels, n_audio_ctx, n_audio_state, n_audio_layer)

    x = jax.random.normal(xkey, (batch, n_mels, n_ctx_in), dtype=jnp.float32)

    out = whisper_encoder_forward(x, params, n_audio_head)
    out = jax.block_until_ready(out)

    assert out.shape == (batch, n_audio_ctx, n_audio_state), out.shape
    assert bool(jnp.all(jnp.isfinite(out)))
    print("KERNEL_OK")
</pallas_src>

<mosaic_0001>
module attributes {stable_mosaic.version = 11 : i64} {
  func.func @_linear_kernel(%arg0: i32, %arg1: i32, %arg2: i32, %arg3: memref<32x48xbf16, #tpu.memory_space<vmem>>, %arg4: memref<48x32xbf16, #tpu.memory_space<vmem>>, %arg5: memref<1x32xf32, #tpu.memory_space<vmem>>, %arg6: memref<32x32xbf16, #tpu.memory_space<vmem>>, %arg7: memref<32x32xf32, #tpu.memory_space<vmem>>) attributes {dimension_semantics = [#tpu.dimension_semantics<parallel>, #tpu.dimension_semantics<parallel>, #tpu.dimension_semantics<arbitrary>], iteration_bounds = array<i64: 1, 1, 1>, scalar_prefetch = 0 : i64, scratch_operands = 1 : i64, tpu.core_type = #tpu.core_type<tc>, window_params = [{transform_indices = @transform_0, window_bounds = array<i64: 32, 48>}, {transform_indices = @transform_1, window_bounds = array<i64: 48, 32>}, {transform_indices = @transform_2, window_bounds = array<i64: 1, 32>}, {transform_indices = @transform_3, window_bounds = array<i64: 32, 32>}]} {
    %c0_i32 = arith.constant 0 : i32
    %0 = arith.cmpi eq, %arg2, %c0_i32 : i32
    %1 = arith.extui %0 : i1 to i32
    %c0_i32_0 = arith.constant 0 : i32
    %2 = arith.cmpi ne, %1, %c0_i32_0 : i32
    scf.if %2 {
      %cst_10 = arith.constant 0.000000e+00 : f32
      %12 = vector.broadcast %cst_10 : f32 to vector<32x32xf32>
      %c0_11 = arith.constant 0 : index
      %c0_12 = arith.constant 0 : index
      %13 = vector.load %arg7[%c0_11, %c0_12] : memref<32x32xf32, #tpu.memory_space<vmem>>, vector<32x32xf32>
      tpu.vector_store %arg7[%c0_11, %c0_12], %12 {strides = array<i32>} : memref<32x32xf32, #tpu.memory_space<vmem>>, vector<32x32xf32>,
    } else {
    }
    %c0 = arith.constant 0 : index
    %c0_1 = arith.constant 0 : index
    %3 = vector.load %arg3[%c0, %c0_1] : memref<32x48xbf16, #tpu.memory_space<vmem>>, vector<32x48xbf16>
    %c0_2 = arith.constant 0 : index
    %c0_3 = arith.constant 0 : index
    %4 = vector.load %arg7[%c0_2, %c0_3] : memref<32x32xf32, #tpu.memory_space<vmem>>, vector<32x32xf32>
    %c0_4 = arith.constant 0 : index
    %c0_5 = arith.constant 0 : index
    %5 = vector.load %arg4[%c0_4, %c0_5] : memref<48x32xbf16, #tpu.memory_space<vmem>>, vector<48x32xbf16>
    %cst = arith.constant dense<0.000000e+00> : vector<32x32xf32>
    %6 = tpu.matmul %3, %5, %cst {dimension_numbers = #tpu.dot_dimension_numbers<[1], [0], [0], [1], [0, 0, 1, 1], [], []>} : vector<32x48xbf16>, vector<48x32xbf16>, vector<32x32xf32> -> vector<32x32xf32>
    %7 = arith.addf %4, %6 : vector<32x32xf32>
    %c0_6 = arith.constant 0 : index
    %c0_7 = arith.constant 0 : index
    %8 = vector.load %arg7[%c0_6, %c0_7] : memref<32x32xf32, #tpu.memory_space<vmem>>, vector<32x32xf32>
    tpu.vector_store %arg7[%c0_6, %c0_7], %7 {strides = array<i32>} : memref<32x32xf32, #tpu.memory_space<vmem>>, vector<32x32xf32>,
    %c0_i32_8 = arith.constant 0 : i32
    %9 = arith.cmpi eq, %arg2, %c0_i32_8 : i32
    %10 = arith.extui %9 : i1 to i32
    %c0_i32_9 = arith.constant 0 : i32
    %11 = arith.cmpi ne, %10, %c0_i32_9 : i32
    scf.if %11 {
      %c0_10 = arith.constant 0 : index
      %c0_11 = arith.constant 0 : index
      %12 = vector.load %arg7[%c0_10, %c0_11] : memref<32x32xf32, #tpu.memory_space<vmem>>, vector<32x32xf32>
      %c0_12 = arith.constant 0 : index
      %c0_13 = arith.constant 0 : index
      %13 = vector.load %arg5[%c0_12, %c0_13] : memref<1x32xf32, #tpu.memory_space<vmem>>, vector<1x32xf32>
      %14 = vector.broadcast %13 : vector<1x32xf32> to vector<32x32xf32>
      %15 = arith.addf %12, %14 : vector<32x32xf32>
      %cst_14 = arith.constant 5.000000e-01 : f32
      %16 = vector.broadcast %cst_14 : f32 to vector<32x32xf32>
      %17 = arith.mulf %16, %15 : vector<32x32xf32>
      %cst_15 = arith.constant 0.707106769 : f32
      %18 = vector.broadcast %cst_15 : f32 to vector<32x32xf32>
      %19 = arith.mulf %15, %18 : vector<32x32xf32>
      %20 = math.erf %19 : vector<32x32xf32>
      %cst_16 = arith.constant 1.000000e+00 : f32
      %21 = vector.broadcast %cst_16 : f32 to vector<32x32xf32>
      %22 = arith.addf %21, %20 : vector<32x32xf32>
      %23 = arith.mulf %17, %22 : vector<32x32xf32>
      %24 = arith.truncf %23 : vector<32x32xf32> to vector<32x32xbf16>
      %c0_17 = arith.constant 0 : index
      %c0_18 = arith.constant 0 : index
      %25 = vector.load %arg6[%c0_17, %c0_18] : memref<32x32xbf16, #tpu.memory_space<vmem>>, vector<32x32xbf16>
      tpu.vector_store %arg6[%c0_17, %c0_18], %24 {strides = array<i32>} : memref<32x32xbf16, #tpu.memory_space<vmem>>, vector<32x32xbf16>,
    } else {
    }
    return
  }
  func.func @transform_0(%arg0: i32, %arg1: i32, %arg2: i32) -> (i32, i32) {
    %c0_i32 = arith.constant 0 : i32
    return %arg0, %arg2 : i32, i32
  }
  func.func @transform_1(%arg0: i32, %arg1: i32, %arg2: i32) -> (i32, i32) {
    %c0_i32 = arith.constant 0 : i32
    return %arg2, %arg1 : i32, i32
  }
  func.func @transform_2(%arg0: i32, %arg1: i32, %arg2: i32) -> (i32, i32) {
    %c0_i32 = arith.constant 0 : i32
    %c0_i32_0 = arith.constant 0 : i32
    return %c0_i32, %arg1 : i32, i32
  }
  func.func @transform_3(%arg0: i32, %arg1: i32, %arg2: i32) -> (i32, i32) {
    %c0_i32 = arith.constant 0 : i32
    return %arg0, %arg1 : i32, i32
  }
}

</mosaic_0001>

<bundles_post_ra>
// kernel: tpu_custom_call.1
= control target key start
LH: loop header
LB: loop body
LE: loop exit
PB: predicated region body
PF: predicated region fallthrough
CT: control target
= control target key end

     0   :  { %vm20_vm0 = vcmask 261120   ;;  %vm67_vm1 = vcmask 392192   ;;  %v277_v3 = vmov 0.0   ;;  %s336_s0 = inlined_call_operand.vmem [shape: bf16[32,48], index: 0, kind: input, shape index: {}]   ;;  %s337_s1 = inlined_call_operand.vmem [shape: bf16[48,32], index: 1, kind: input, shape index: {}]   ;;  %s338_s2 = inlined_call_operand.vmem [shape: f32[1,32], index: 2, kind: input, shape index: {}]   ;;  %s339_s3 = inlined_call_operand.hbm [shape: bf16[32,32], index: 3, kind: output, shape index: {}]  }
   0x1   :  { %v242_v0 = vld [vmem:[%s337_s1 + $0x10] sm:$0xff]   ;;  %v243_v1 = vld [vmem:[%s337_s1 + $0x8] sm:$0xff]   ;;  %v245_v2 = vld [vmem:[%s336_s0] sm:$0xff]   ;;  %23 = vst.msk [vmem:[#allocation2 + $0x10] sm:$0xff] %vm20_vm0, %v277_v3 }
   0x2   :  { %228 = vmatprep.subr.bf16.mxu0 %v242_v0  ;;  %21 = vst.msk [vmem:[#allocation2] sm:$0xff] %vm20_vm0, %v277_v3  ;;  %22 = vst.msk [vmem:[#allocation2 + $0x8] sm:$0xff] %vm20_vm0, %v277_v3  ;;  %v244_v4 = vld [vmem:[%s337_s1] sm:$0xff]   ;;  %234 = vmatprep.mubr.msk.bf16.mxu0 %vm67_vm1, %v245_v2 }
   0x3   :  { %229 = vmatpush3.bf16.msra.mxu0 %v242_v0  ;;  %24 = vst.msk [vmem:[#allocation2 + $0x18] sm:$0xff] %vm20_vm0, %v277_v3 }
   0x4   :  { %230 = vmatprep.subr.bf16.mxu0 %v243_v1 }
   0x5   :  { %8 = vsyncpa [#allocation4], 0  ;;  %v246_v5 = vld [vmem:[%s336_s0 + $0x8] sm:$0xff]   ;;  %v214_v18 = vld [vmem:[%s338_s2] ss:$0 sm:$0xff]  ;;  %vm186_vm2 = vcmask 257024  }
   0x6   :  { %s278_s2 = smov [#allocation3]  }
   0x7   :  { %231 = vmatpush3.bf16.msra.mxu0 %v243_v1  ;;  %s196_s22 = sshll.u32 %s278_s2, 4  ;;  %s197_s22 = int_to_ptr.vmem [resolvable:$true] %s196_s22 }
   0x8   :  { %232 = vmatprep.subr.bf16.mxu0 %v244_v4  ;;  %v31_v6 = vld [vmem:[#allocation2 + $0x10] sm:$0xff]  ;;  %s255_s23 = scalar_lea.vmem %s197_s22, 256  ;;  %p260_p1 = scmp.lt.s32.totalorder %s197_s22, %s197_s22 }
   0x9   :  { %v29_v8 = vld [vmem:[#allocation2] sm:$0xff]  ;;  %v30_v14 = vld [vmem:[#allocation2 + $0x8] sm:$0xff]  ;;  %p256_p0 = scmp.ne.s32.totalorder %s197_s22, %s255_s23  ;;  %p261_p2 = scmp.lt.s32.totalorder %s255_s23, %s255_s23 }
   0xa   :  { %v32_v11 = vld [vmem:[#allocation2 + $0x18] sm:$0xff] }
   0xb   :  { %233 = vmatpush3.bf16.msra.mxu0 %v244_v4  ;;  %p262_p3 = por %p261_p2, %p260_p1 }
   0xd   :  { %p263_p4 = pnand %p262_p3, %p256_p0 }
   0xe   :  { %235 = vmatmul.mubr.msk.bf16.vlgmr.msra.gmra.mxu0 %vm67_vm1, %v246_v5 }
  0xce   :  { %v236_v7 = vpop.f32.mrf.mxu0 }
  0xcf   :  { %v125_v9 = vadd.f32 %v236_v7, %v31_v6 }
  0xd0   :  { %v108_v10 = vpop.f32.mrf.mxu0 }
  0xd1   :  { %130 = vst.msk [vmem:[#allocation2 + $0x10] sm:$0xff] %vm20_vm0, %v125_v9  ;;  %v123_v12 = vadd.f32 %v108_v10, %v29_v8 }
  0xd2   :  { %v237_v13 = vpop.f32.mrf.mxu0 }
  0xd3   :  { %128 = vst.msk [vmem:[#allocation2] sm:$0xff] %vm20_vm0, %v123_v12  ;;  %v126_v15 = vadd.f32 %v237_v13, %v32_v11 }
  0xd4   :  { %v111_v16 = vpop.f32.mrf.mxu0 }
  0xd5   :  { %131 = vst.msk [vmem:[#allocation2 + $0x18] sm:$0xff] %vm20_vm0, %v126_v15  ;;  %v124_v17 = vadd.f32 %v111_v16, %v30_v14 }
  0xd7   :  { %129 = vst.msk [vmem:[#allocation2 + $0x8] sm:$0xff] %vm20_vm0, %v124_v17 }
  0xd8   :  { %v137_v19 = vld [vmem:[#allocation2 + $0x10] sm:$0xff] }
  0xd9   :  { %v148_v20 = vadd.f32 %v214_v18, %v137_v19 }
  0xda   :  { %v135_v21 = vld [vmem:[#allocation2] sm:$0xff] }
  0xdb   :  { %v146_v22 = vadd.f32 %v214_v18, %v135_v21  ;;  %v156_v23 = vmul.f32 0.70710677, %v148_v20  ;;  %v152_v32 = vmul.f32 0.5, %v148_v20 }
  0xdc   :  { %v138_v24 = vld [vmem:[#allocation2 + $0x18] sm:$0xff] }
  0xdd   :  { %v149_v25 = vadd.f32 %v214_v18, %v138_v24  ;;  %v154_v26 = vmul.f32 0.70710677, %v146_v22  ;;  %247 = verf.f32 %v156_v23  ;;  %v150_v35 = vmul.f32 0.5, %v146_v22 }
  0xde   :  { %v136_v27 = vld [vmem:[#allocation2 + $0x8] sm:$0xff] }
  0xdf   :  { %v147_v28 = vadd.f32 %v214_v18, %v136_v27  ;;  %v157_v29 = vmul.f32 0.70710677, %v149_v25  ;;  %249 = verf.f32 %v154_v26  ;;  %v153_v39 = vmul.f32 0.5, %v149_v25 }
  0xe1   :  { %v155_v30 = vmul.f32 0.70710677, %v147_v28  ;;  %251 = verf.f32 %v157_v29  ;;  %v151_v44 = vmul.f32 0.5, %v147_v28 }
  0xe3   :  { %253 = verf.f32 %v155_v30 }
  0xea   :  { %v248_v31 = vpop.eup %247 }
  0xeb   :  { %v164_v33 = vadd.f32 1.0, %v248_v31 }
  0xec   :  { %v250_v34 = vpop.eup %249 }
  0xed   :  { %v162_v36 = vadd.f32 1.0, %v250_v34  ;;  %v168_v37 = vmul.f32 %v164_v33, %v152_v32 }
  0xee   :  { %v252_v38 = vpop.eup %251 }
  0xef   :  { %v165_v40 = vadd.f32 1.0, %v252_v38  ;;  %v166_v41 = vmul.f32 %v162_v36, %v150_v35  ;;  %v221_v42 = vpack.c.bf16 %v168_v37, %v168_v37 }
  0xf0   :  { %v254_v43 = vpop.eup %253 }
  0xf1   :  { %v163_v45 = vadd.f32 1.0, %v254_v43  ;;  %v169_v46 = vmul.f32 %v165_v40, %v153_v39  ;;  %v219_v47 = vpack.c.bf16 %v166_v41, %v166_v41  ;;  %189 = vst.msk [vmem:[#allocation3 + $0x8] sm:$0xf] %vm186_vm2, %v221_v42 }
  0xf3   :  { %v167_v48 = vmul.f32 %v163_v45, %v151_v44  ;;  %v222_v49 = vpack.c.bf16 %v169_v46, %v169_v46  ;;  %187 = vst.msk [vmem:[#allocation3] sm:$0xf] %vm186_vm2, %v219_v47 }
  0xf5   :  { %v220_v50 = vpack.c.bf16 %v167_v48, %v167_v48  ;;  %190 = vst.msk [vmem:[#allocation3 + $0xc] sm:$0xf] %vm186_vm2, %v222_v49 }
  0xf7   :  { %188 = vst.msk [vmem:[#allocation3 + $0x4] sm:$0xf] %vm186_vm2, %v220_v50 }
  0xf8   :  { %266 = shalt.err (!%p263_p4)
}
  0xf9   :  { %s279_s24 = smov 64   ;;  %s280_s25 = smov 4  }
  0xfa   :  { %202 = dma.vmem_to_hbm [thread:$0]  %s197_s22, 256, %s339_s3, [#allocation4], %s279_s24, %s279_s24, %s280_s25  }
  0xfb   :  { %275 = dma.done.wait [#allocation4], 256  }
  0xfc   :  { %276 = vsyncadd [#allocation4], 4294967040 }
  0xfd   :  { %206 = vsyncpa [#allocation4], 1 }

</bundles_post_ra>
